<compile_context>
chip_gen: v6e
topology: v6e:2x2x1
jax: 0.10.0
libtpu: 0.0.40
codegen_flags: <defaults>
</compile_context>

<pallas_src>
import jax
import jax.numpy as jnp
from jax.experimental import pallas as pl
from jax.experimental.pallas import tpu as pltpu


# -----------------------------------------------------------------------------
# Kernel (batch on the lane axis)
# -----------------------------------------------------------------------------
def _qnet_kernel(xt_ref, w1_ref, b1_ref, w2_ref, b2_ref, ot_ref):
    # xt_ref: (IN, TB)      w1_ref: (H, IN)    b1_ref: (H, 1)
    # w2_ref: (OUT, H, 1)   b2_ref: (OUT, 1)   ot_ref: (OUT, TB)
    xt = xt_ref[...]

    # Layer 1 on the MXU: (H, IN) @ (IN, TB) -> (H, TB), f32 accumulation.
    h = jnp.dot(w1_ref[...], xt, preferred_element_type=jnp.float32)
    h = jnp.maximum(h + b1_ref[...], 0.0)                      # ReLU, (H, TB) f32

    # Layer 2 off the MXU (OUT is tiny): each output row is a broadcast
    # multiply of h by one weight column plus a sublane reduction (VPU+XLU).
    rows = []
    for j in range(w2_ref.shape[0]):                           # OUT static, small
        wj = w2_ref[j]                                         # (H, 1)
        rows.append(jnp.sum(h * wj, axis=0, keepdims=True))    # (1, TB)
    o = jnp.concatenate(rows, axis=0) + b2_ref[...]            # (OUT, TB)

    ot_ref[...] = o.astype(ot_ref.dtype)


# -----------------------------------------------------------------------------
# Parameter handling (layout conversion happens ONCE, not per forward call)
# -----------------------------------------------------------------------------
def params_from_torch(w1, b1, w2, b2):
    """PyTorch-layout params -> kernel layout.

    w1: (H, IN) stays as-is, b1 -> (H, 1), w2: (OUT, H) -> (OUT, H, 1),
    b2 -> (OUT, 1).
    """
    w1 = jnp.asarray(w1)                                  # (H, IN)
    b1 = jnp.asarray(b1).reshape(-1, 1)                   # (H, 1)
    w2 = jnp.asarray(w2)                                  # (OUT, H)
    b2 = jnp.asarray(b2).reshape(-1, 1)                   # (OUT, 1)
    return w1, b1, w2.reshape(w2.shape[0], w2.shape[1], 1), b2


def init_qnet_params(key, input_size, hidden_size, output_size, dtype=jnp.float32):
    """PyTorch-default-style init U(-1/sqrt(fan_in), 1/sqrt(fan_in)) in kernel layout."""
    k1, k2, k3, k4 = jax.random.split(key, 4)
    bound1 = 1.0 / (input_size ** 0.5)
    bound2 = 1.0 / (hidden_size ** 0.5)
    w1 = jax.random.uniform(k1, (hidden_size, input_size), dtype, -bound1, bound1)
    b1 = jax.random.uniform(k2, (hidden_size,), dtype, -bound1, bound1)
    w2 = jax.random.uniform(k3, (output_size, hidden_size), dtype, -bound2, bound2)
    b2 = jax.random.uniform(k4, (output_size,), dtype, -bound2, bound2)
    return params_from_torch(w1, b1, w2, b2)


# -----------------------------------------------------------------------------
# Forward wrapper
# -----------------------------------------------------------------------------
def _round_up(n, m):
    return ((n + m - 1) // m) * m


def linear_qnet_forward(x, params, *, max_batch_tile=8192, core_parallel=False):
    """x: (B, IN) (or (IN,) for single inference).  Returns (B, OUT) (or (OUT,)).

    params = (w1 (H,IN), b1 (H,1), w2 (OUT,H,1), b2 (OUT,1)) in kernel layout.
    Set core_parallel=True on v7x to split the batch axis across both TCs.
    """
    w1, b1, w2b, b2 = params
    squeeze = (x.ndim == 1)
    if squeeze:
        x = x[None, :]
    B, in_features = x.shape
    hidden = w1.shape[0]
    out_features = w2b.shape[0]
    assert in_features == w1.shape[1]
    assert max_batch_tile % 128 == 0 and max_batch_tile >= 128

    # Padding policy: pad each tile to a lane multiple (128), never ~2x the batch.
    num_tiles = pl.cdiv(B, max_batch_tile)
    tb = _round_up(pl.cdiv(B, num_tiles), 128)
    b_padded = num_tiles * tb

    # One transpose outside the hot loop -> batch lives on the lane axis.
    xt = x.T                                              # (IN, B)
    if b_padded != B:
        # Padded columns produce garbage but are sliced off below.
        xt = jnp.pad(xt, ((0, 0), (0, b_padded - B)))

    vmem = pltpu.MemorySpace.VMEM
    batch_sem = pltpu.CORE_PARALLEL if core_parallel else "parallel"

    out_t = pl.pallas_call(
        _qnet_kernel,
        out_shape=jax.ShapeDtypeStruct((out_features, b_padded), x.dtype),
        grid=(num_tiles,),
        in_specs=[
            pl.BlockSpec((in_features, tb), lambda i: (0, i), memory_space=vmem),
            pl.BlockSpec((hidden, in_features), lambda i: (0, 0), memory_space=vmem),
            pl.BlockSpec((hidden, 1), lambda i: (0, 0), memory_space=vmem),
            pl.BlockSpec((out_features, hidden, 1), lambda i: (0, 0, 0), memory_space=vmem),
            pl.BlockSpec((out_features, 1), lambda i: (0, 0), memory_space=vmem),
        ],
        out_specs=pl.BlockSpec((out_features, tb), lambda i: (0, i), memory_space=vmem),
        compiler_params=pltpu.CompilerParams(
            dimension_semantics=(batch_sem,),
        ),
    )(xt, w1, b1, w2b, b2)

    out = out_t[:, :B].T                                  # (B, OUT)
    if squeeze:
        out = out[0]
    return out


def _reference(x, params):
    w1, b1, w2b, b2 = params
    h = jnp.maximum(x @ w1.T + b1[:, 0], 0.0)
    return h @ w2b[:, :, 0].T + b2[:, 0]


# TODO(synk): Linear_QNet.save() (torch.save of the state_dict) is file I/O with
# no Pallas equivalent; only the forward pass is implemented here.


# -----------------------------------------------------------------------------
# Self-test
# -----------------------------------------------------------------------------
if __name__ == "__main__":
    # Shapes implied by the module usage: Linear_QNet(11, 32, 3)
    input_size, hidden_size, output_size = 11, 32, 3

    key = jax.random.PRNGKey(0)
    kx1, kx2, kp = jax.random.split(key, 3)
    params = init_qnet_params(kp, input_size, hidden_size, output_size)

    # Case 1: tiny single-tile batch (pads 8 -> 128 lanes; overhead-bound path).
    x_small = jax.random.normal(kx1, (8, input_size), jnp.float32)
    out_small = jax.block_until_ready(linear_qnet_forward(x_small, params))
    assert out_small.shape == (8, output_size)
    assert jnp.allclose(out_small, _reference(x_small, params), atol=1e-5, rtol=1e-5)

    # Case 2: ragged batch with a small tile cap to exercise the multi-step grid
    # and the new padding policy (B=300, cap 128 -> 3 tiles of 128, pad to 384).
    x_batched = jax.random.normal(kx2, (300, input_size), jnp.float32)
    out_batched = jax.block_until_ready(
        linear_qnet_forward(x_batched, params, max_batch_tile=128)
    )
    assert out_batched.shape == (300, output_size)
    assert jnp.allclose(out_batched, _reference(x_batched, params), atol=1e-5, rtol=1e-5)

    print("KERNEL_OK")
</pallas_src>

<mosaic_0001>
module attributes {stable_mosaic.version = 11 : i64} {
  func.func @_qnet_kernel(%arg0: i32, %arg1: memref<11x128xf32, #tpu.memory_space<vmem>>, %arg2: memref<32x11xf32, #tpu.memory_space<vmem>>, %arg3: memref<32x1xf32, #tpu.memory_space<vmem>>, %arg4: memref<3x32x1xf32, #tpu.memory_space<vmem>>, %arg5: memref<3x1xf32, #tpu.memory_space<vmem>>, %arg6: memref<3x128xf32, #tpu.memory_space<vmem>>) attributes {dimension_semantics = [#tpu.dimension_semantics<parallel>], iteration_bounds = array<i64: 1>, scalar_prefetch = 0 : i64, scratch_operands = 0 : i64, tpu.core_type = #tpu.core_type<tc>, window_params = [{transform_indices = @transform_0, window_bounds = array<i64: 11, 128>}, {pipeline_mode = #tpu.pipeline_mode<synchronous>, transform_indices = @transform_1, window_bounds = array<i64: 32, 11>}, {pipeline_mode = #tpu.pipeline_mode<synchronous>, transform_indices = @transform_2, window_bounds = array<i64: 32, 1>}, {pipeline_mode = #tpu.pipeline_mode<synchronous>, transform_indices = @transform_3, window_bounds = array<i64: 3, 32, 1>}, {pipeline_mode = #tpu.pipeline_mode<synchronous>, transform_indices = @transform_4, window_bounds = array<i64: 3, 1>}, {transform_indices = @transform_5, window_bounds = array<i64: 3, 128>}]} {
    %c0 = arith.constant 0 : index
    %c0_0 = arith.constant 0 : index
    %0 = vector.load %arg1[%c0, %c0_0] : memref<11x128xf32, #tpu.memory_space<vmem>>, vector<11x128xf32>
    %c0_1 = arith.constant 0 : index
    %c0_2 = arith.constant 0 : index
    %1 = vector.load %arg2[%c0_1, %c0_2] : memref<32x11xf32, #tpu.memory_space<vmem>>, vector<32x11xf32>
    %cst = arith.constant dense<0.000000e+00> : vector<32x128xf32>
    %2 = tpu.matmul %1, %0, %cst {dimension_numbers = #tpu.dot_dimension_numbers<[1], [0], [0], [1], [0, 0, 1, 1], [], []>} : vector<32x11xf32>, vector<11x128xf32>, vector<32x128xf32> -> vector<32x128xf32>
    %c0_3 = arith.constant 0 : index
    %c0_4 = arith.constant 0 : index
    %3 = vector.load %arg3[%c0_3, %c0_4] : memref<32x1xf32, #tpu.memory_space<vmem>>, vector<32x1xf32>
    %4 = vector.broadcast %3 : vector<32x1xf32> to vector<32x128xf32>
    %5 = arith.addf %2, %4 : vector<32x128xf32>
    %cst_5 = arith.constant 0.000000e+00 : f32
    %6 = vector.broadcast %cst_5 : f32 to vector<32x128xf32>
    %7 = arith.maximumf %5, %6 : vector<32x128xf32>
    %c0_6 = arith.constant 0 : index
    %c0_7 = arith.constant 0 : index
    %c0_8 = arith.constant 0 : index
    %8 = vector.load %arg4[%c0_6, %c0_7, %c0_8] : memref<3x32x1xf32, #tpu.memory_space<vmem>>, vector<1x32x1xf32>
    %9 = vector.shape_cast %8 : vector<1x32x1xf32> to vector<32x1xf32>
    %10 = vector.broadcast %9 : vector<32x1xf32> to vector<32x128xf32>
    %11 = arith.mulf %7, %10 : vector<32x128xf32>
    %cst_9 = arith.constant dense<0.000000e+00> : vector<128xf32>
    %12 = vector.multi_reduction <add>, %11, %cst_9 [0] : vector<32x128xf32> to vector<128xf32>
    %13 = vector.shape_cast %12 : vector<128xf32> to vector<1x128xf32>
    %c1 = arith.constant 1 : index
    %c0_10 = arith.constant 0 : index
    %c0_11 = arith.constant 0 : index
    %14 = vector.load %arg4[%c1, %c0_10, %c0_11] : memref<3x32x1xf32, #tpu.memory_space<vmem>>, vector<1x32x1xf32>
    %15 = vector.shape_cast %14 : vector<1x32x1xf32> to vector<32x1xf32>
    %16 = vector.broadcast %15 : vector<32x1xf32> to vector<32x128xf32>
    %17 = arith.mulf %7, %16 : vector<32x128xf32>
    %cst_12 = arith.constant dense<0.000000e+00> : vector<128xf32>
    %18 = vector.multi_reduction <add>, %17, %cst_12 [0] : vector<32x128xf32> to vector<128xf32>
    %19 = vector.shape_cast %18 : vector<128xf32> to vector<1x128xf32>
    %c2 = arith.constant 2 : index
    %c0_13 = arith.constant 0 : index
    %c0_14 = arith.constant 0 : index
    %20 = vector.load %arg4[%c2, %c0_13, %c0_14] : memref<3x32x1xf32, #tpu.memory_space<vmem>>, vector<1x32x1xf32>
    %21 = vector.shape_cast %20 : vector<1x32x1xf32> to vector<32x1xf32>
    %22 = vector.broadcast %21 : vector<32x1xf32> to vector<32x128xf32>
    %23 = arith.mulf %7, %22 : vector<32x128xf32>
    %cst_15 = arith.constant dense<0.000000e+00> : vector<128xf32>
    %24 = vector.multi_reduction <add>, %23, %cst_15 [0] : vector<32x128xf32> to vector<128xf32>
    %25 = vector.shape_cast %24 : vector<128xf32> to vector<1x128xf32>
    %26 = tpu.concatenate %13, %19, %25 in 0 : vector<1x128xf32>, vector<1x128xf32>, vector<1x128xf32> -> vector<3x128xf32>
    %c0_16 = arith.constant 0 : index
    %c0_17 = arith.constant 0 : index
    %27 = vector.load %arg5[%c0_16, %c0_17] : memref<3x1xf32, #tpu.memory_space<vmem>>, vector<3x1xf32>
    %28 = vector.broadcast %27 : vector<3x1xf32> to vector<3x128xf32>
    %29 = arith.addf %26, %28 : vector<3x128xf32>
    %c0_18 = arith.constant 0 : index
    %c0_19 = arith.constant 0 : index
    %30 = vector.load %arg6[%c0_18, %c0_19] : memref<3x128xf32, #tpu.memory_space<vmem>>, vector<3x128xf32>
    tpu.vector_store %arg6[%c0_18, %c0_19], %29 {strides = array<i32>} : memref<3x128xf32, #tpu.memory_space<vmem>>, vector<3x128xf32>,
    return
  }
  func.func @transform_0(%arg0: i32) -> (i32, i32) {
    %c0_i32 = arith.constant 0 : i32
    %c0_i32_0 = arith.constant 0 : i32
    return %c0_i32, %arg0 : i32, i32
  }
  func.func @transform_1(%arg0: i32) -> (i32, i32) {
    %c0_i32 = arith.constant 0 : i32
    %c0_i32_0 = arith.constant 0 : i32
    %c0_i32_1 = arith.constant 0 : i32
    return %c0_i32, %c0_i32_0 : i32, i32
  }
  func.func @transform_2(%arg0: i32) -> (i32, i32) {
    %c0_i32 = arith.constant 0 : i32
    %c0_i32_0 = arith.constant 0 : i32
    %c0_i32_1 = arith.constant 0 : i32
    return %c0_i32, %c0_i32_0 : i32, i32
  }
  func.func @transform_3(%arg0: i32) -> (i32, i32, i32) {
    %c0_i32 = arith.constant 0 : i32
    %c0_i32_0 = arith.constant 0 : i32
    %c0_i32_1 = arith.constant 0 : i32
    %c0_i32_2 = arith.constant 0 : i32
    return %c0_i32, %c0_i32_0, %c0_i32_1 : i32, i32, i32
  }
  func.func @transform_4(%arg0: i32) -> (i32, i32) {
    %c0_i32 = arith.constant 0 : i32
    %c0_i32_0 = arith.constant 0 : i32
    %c0_i32_1 = arith.constant 0 : i32
    return %c0_i32, %c0_i32_0 : i32, i32
  }
  func.func @transform_5(%arg0: i32) -> (i32, i32) {
    %c0_i32 = arith.constant 0 : i32
    %c0_i32_0 = arith.constant 0 : i32
    return %c0_i32, %arg0 : i32, i32
  }
}

</mosaic_0001>

<bundles_post_ra>
// kernel: tpu_custom_call.1
= control target key start
LH: loop header
LB: loop body
LE: loop exit
PB: predicated region body
PF: predicated region fallthrough
CT: control target
= control target key end

     0   :  { %vm64_vm0 = vcmask 1042432   ;;  %vm51_vm1 = vcmask 89088   ;;  %v355_v8 = vmov 0   ;;  %s459_s0 = inlined_call_operand.vmem [shape: f32[11,128], index: 0, kind: input, shape index: {}]   ;;  %s460_s1 = inlined_call_operand.vmem [shape: f32[32,11], index: 1, kind: input, shape index: {}]   ;;  %s461_s2 = inlined_call_operand.vmem [shape: f32[32,1], index: 2, kind: input, shape index: {}]   ;;  %s462_s3 = inlined_call_operand.vmem [shape: f32[3,32,1], index: 3, kind: input, shape index: {}]   ;;  %s463_s4 = inlined_call_operand.vmem [shape: f32[3,1], index: 4, kind: input, shape index: {}]   ;;  %s464_s5 = inlined_call_operand.hbm [shape: f32[3,128], index: 5, kind: output, shape index: {}]  }
   0x1   :  { %v22_v0 = vld [vmem:[%s459_s0 + $0x8] sm:$0x7]  ;;  %v21_v1 = vld [vmem:[%s459_s0] sm:$0xff]  ;;  %v25_v3 = vld [vmem:[%s460_s1 + $0x10] sm:$0xff]  ;;  %331 = vset.pattern.permute.xlu0 %v355_v8  ;;  %332 = vset.pattern.permute.xlu1 %v355_v8 }
   0x2   :  { %315 = vmatprep.subr.msk.mxu0 %vm64_vm0, %v22_v0  ;;  %325 = vmatprep.subr.msk.mxu1 %vm64_vm0, %v22_v0  ;;  %v23_v2 = vld [vmem:[%s460_s1] sm:$0xff]  ;;  %v24_v4 = vld [vmem:[%s460_s1 + $0x8] sm:$0xff]  ;;  %v26_v5 = vld [vmem:[%s460_s1 + $0x18] sm:$0xff] }
   0x3   :  { %316 = vmatpush3.msk.msra.mxu0 %vm64_vm0, %v22_v0  ;;  %327 = vmatpush3.msk.msra.mxu1 %vm64_vm0, %v22_v0  ;;  %v27_v6 = vld [vmem:[%s461_s2] sm:$0xff]  ;;  %v29_v7 = vld [vmem:[%s461_s2 + $0x10] sm:$0xff] }
   0x4   :  { %317 = vmatprep.subr.mxu0 %v21_v1  ;;  %326 = vmatprep.subr.mxu1 %v21_v1 }
   0x5   :  { %318 = vmatpush3.msra.mxu0 %v21_v1  ;;  %328 = vmatpush3.msra.mxu1 %v21_v1 }
   0x6   :  { %319 = vmatprep.mubr.msk.f32.mxu0 %vm51_vm1, %v23_v2  ;;  %322 = vmatprep.mubr.msk.f32.mxu1 %vm51_vm1, %v25_v3 }
   0x7   :  { %320 = vmatmul.mubr.msk.f32.vlgmr.msra.gmra.mxu0 %vm51_vm1, %v24_v4  ;;  %323 = vmatmul.mubr.msk.f32.vlgmr.msra.gmra.mxu1 %vm51_vm1, %v26_v5 }
   0x8   :  { %10 = vsyncpa [#allocation3], 0  ;;  %33 = vperm.xlu0 %331, %v27_v6   ;;  %43 = vperm.xlu1 %332, %v29_v7   ;;  %v28_v9 = vld [vmem:[%s461_s2 + $0x8] sm:$0xff]  ;;  %v30_v10 = vld [vmem:[%s461_s2 + $0x18] sm:$0xff]  ;;  %vm270_vm2 = vcmask 1040384   ;;  %vm272_vm3 = vcmask 1041408  }
   0x9   :  { %v157_v11 = vld [vmem:[%s462_s3] sm:$0xff]  ;;  %v158_v12 = vld [vmem:[%s462_s3 + $0x8] sm:$0xff]  ;;  %v159_v17 = vld [vmem:[%s462_s3 + $0x10] sm:$0xff] }
   0xa   :  { %v301_v13 = vld [vmem:[%s462_s3 + $0x20] sm:$0xff]  ;;  %v302_v14 = vld [vmem:[%s462_s3 + $0x28] sm:$0xff]  ;;  %v303_v18 = vld [vmem:[%s462_s3 + $0x30] sm:$0xff] }
   0xb   :  { %v305_v15 = vld [vmem:[%s462_s3 + $0x40] sm:$0xff]  ;;  %v306_v16 = vld [vmem:[%s462_s3 + $0x48] sm:$0xff]  ;;  %v307_v19 = vld [vmem:[%s462_s3 + $0x50] sm:$0xff] }
   0xc   :  { %38 = vperm.xlu0 %331, %v28_v9   ;;  %48 = vperm.xlu1 %332, %v30_v10   ;;  %v160_v20 = vld [vmem:[%s462_s3 + $0x18] sm:$0xff]  ;;  %v274_v23 = vld [vmem:[%s463_s4] sm:$0x7] }
   0xd   :  { %v304_v21 = vld [vmem:[%s462_s3 + $0x38] sm:$0xff] }
   0xe   :  { %v308_v22 = vld [vmem:[%s462_s3 + $0x58] sm:$0xff]  ;;  %s356_s3 = smov [#allocation2]  }
   0xf   :  { %s288_s4 = sshll.u32 %s356_s3, 4  ;;  %s289_s4 = int_to_ptr.vmem [resolvable:$true] %s288_s4 }
  0x10   :  { %163 = vperm.xlu0 %331, %v157_v11   ;;  %168 = vperm.xlu1 %332, %v158_v12   ;;  %s333_s9 = scalar_lea.vmem %s289_s4, 64  ;;  %p338_p1 = scmp.lt.s32.totalorder %s289_s4, %s289_s4 }
  0x11   :  { %p334_p0 = scmp.ne.s32.totalorder %s289_s4, %s333_s9  ;;  %p339_p2 = scmp.lt.s32.totalorder %s333_s9, %s333_s9 }
  0x13   :  { %p340_p3 = por %p339_p2, %p338_p1 }
  0x14   :  { %201 = vperm.xlu0 %331, %v301_v13   ;;  %206 = vperm.xlu1 %332, %v302_v14  }
  0x15   :  { %p341_p4 = pnand %p340_p3, %p334_p0 }
  0x18   :  { %239 = vperm.xlu0 %331, %v305_v15   ;;  %244 = vperm.xlu1 %332, %v306_v16  }
  0x1c   :  { %173 = vperm.xlu0 %331, %v159_v17   ;;  %211 = vperm.xlu1 %332, %v303_v18  }
  0x20   :  { %249 = vperm.xlu0 %331, %v307_v19   ;;  %178 = vperm.xlu1 %332, %v160_v20  }
  0x24   :  { %216 = vperm.xlu0 %331, %v304_v21   ;;  %254 = vperm.xlu1 %332, %v308_v22  }
  0x28   :  { %277 = vperm.xlu0 %331, %v274_v23  }
  0x83   :  { %v34_v24 = vpop.permute.xlu0 %33  ;;  %v44_v25 = vpop.permute.xlu1 %43 }
  0x87   :  { %v39_v26 = vpop.permute.xlu0 %38  ;;  %v49_v27 = vpop.permute.xlu1 %48 }
  0x8b   :  { %v164_v28 = vpop.permute.xlu0 %163  ;;  %v169_v29 = vpop.permute.xlu1 %168 }
  0x8f   :  { %v202_v30 = vpop.permute.xlu0 %201  ;;  %v207_v31 = vpop.permute.xlu1 %206 }
  0x93   :  { %v240_v32 = vpop.permute.xlu0 %239  ;;  %v245_v33 = vpop.permute.xlu1 %244 }
  0x97   :  { %v174_v34 = vpop.permute.xlu0 %173  ;;  %v212_v35 = vpop.permute.xlu1 %211 }
  0x9b   :  { %v250_v45 = vpop.permute.xlu0 %249  ;;  %v179_v46 = vpop.permute.xlu1 %178 }
  0x9f   :  { %v217_v58 = vpop.permute.xlu0 %216  ;;  %v255_v63 = vpop.permute.xlu1 %254 }
  0xc7   :  { %v321_v36 = vpop.f32.mrf.mxu0  ;;  %v324_v37 = vpop.f32.mrf.mxu1 }
  0xc8   :  { %v140_v38 = vadd.f32 %v321_v36, %v39_v26  ;;  %v150_v42 = vadd.f32 %v324_v37, %v49_v27 }
  0xc9   :  { %v134_v39 = vpop.f32.mrf.mxu0  ;;  %v144_v40 = vpop.f32.mrf.mxu1 }
  0xca   :  { %v154_v41 = vmax.f32 %v140_v38, 0.0  ;;  %v135_v43 = vadd.f32 %v134_v39, %v34_v24  ;;  %v145_v44 = vadd.f32 %v144_v40, %v44_v25  ;;  %v156_v51 = vmax.f32 %v150_v42, 0.0 }
  0xcc   :  { %v153_v47 = vmax.f32 %v135_v43, 0.0  ;;  %v155_v48 = vmax.f32 %v145_v44, 0.0  ;;  %v182_v49 = vmul.f32 %v169_v29, %v154_v41  ;;  %v220_v50 = vmul.f32 %v207_v31, %v154_v41 }
  0xcd   :  { %v258_v52 = vmul.f32 %v245_v33, %v154_v41  ;;  %v184_v0 = vmul.f32 %v179_v46, %v156_v51  ;;  %v222_v1 = vmul.f32 %v217_v58, %v156_v51  ;;  %v260_v2 = vmul.f32 %v255_v63, %v156_v51 }
  0xce   :  { %v181_v53 = vmul.f32 %v164_v28, %v153_v47  ;;  %v219_v54 = vmul.f32 %v202_v30, %v153_v47  ;;  %v257_v55 = vmul.f32 %v240_v32, %v153_v47  ;;  %v183_v56 = vmul.f32 %v174_v34, %v155_v48  ;;  %v278_v28 = vpop.permute.xlu0 %277 }
  0xcf   :  { %v221_v57 = vmul.f32 %v212_v35, %v155_v48  ;;  %v259_v62 = vmul.f32 %v250_v45, %v155_v48 }
  0xd0   :  { %v185_v59 = vadd.f32 %v182_v49, %v181_v53  ;;  %v223_v60 = vadd.f32 %v220_v50, %v219_v54  ;;  %v261_v61 = vadd.f32 %v258_v52, %v257_v55 }
  0xd2   :  { %v186_v3 = vadd.f32 %v185_v59, %v183_v56  ;;  %v224_v4 = vadd.f32 %v223_v60, %v221_v57  ;;  %v262_v5 = vadd.f32 %v261_v61, %v259_v62 }
  0xd4   :  { %v187_v6 = vadd.f32 %v186_v3, %v184_v0  ;;  %v225_v7 = vadd.f32 %v224_v4, %v222_v1  ;;  %v263_v8 = vadd.f32 %v262_v5, %v260_v2 }
  0xd6   :  { %v188_v9 = vrot.slane %v187_v6, 4  ;;  %v226_v10 = vrot.slane %v225_v7, 4  ;;  %v264_v11 = vrot.slane %v263_v8, 4 }
  0xd8   :  { %v189_v12 = vadd.f32 %v188_v9, %v187_v6  ;;  %v227_v13 = vadd.f32 %v226_v10, %v225_v7  ;;  %v265_v14 = vadd.f32 %v264_v11, %v263_v8 }
  0xda   :  { %v190_v15 = vrot.slane %v189_v12, 2  ;;  %v228_v16 = vrot.slane %v227_v13, 2  ;;  %v266_v17 = vrot.slane %v265_v14, 2 }
  0xdc   :  { %v191_v18 = vadd.f32 %v190_v15, %v189_v12  ;;  %v229_v19 = vadd.f32 %v228_v16, %v227_v13  ;;  %v267_v20 = vadd.f32 %v266_v17, %v265_v14 }
  0xde   :  { %v192_v21 = vrot.slane %v191_v18, 1  ;;  %v230_v22 = vrot.slane %v229_v19, 1  ;;  %v268_v23 = vrot.slane %v267_v20, 1 }
  0xe0   :  { %v193_v24 = vadd.f32 %v192_v21, %v191_v18  ;;  %v231_v25 = vadd.f32 %v230_v22, %v229_v19  ;;  %v269_v26 = vadd.f32 %v268_v23, %v267_v20 }
  0xe2   :  { %v271_v27 = vsel %vm270_vm2, %v193_v24, %v231_v25 }
  0xe3   :  { %v273_v29 = vsel %vm272_vm3, %v271_v27, %v269_v26 }
  0xe4   :  { %v280_v30 = vadd.f32 %v278_v28, %v273_v29 }
  0xe6   :  { %281 = vst [vmem:[#allocation2] sm:$0x7] %v280_v30 }
  0xe7   :  { %344 = shalt.err (!%p341_p4)
}
  0xe8   :  { %291 = dma.vmem_to_hbm [thread:$0]  %s289_s4, 64, %s464_s5, [#allocation3]  }
  0xe9   :  { %353 = dma.done.wait [#allocation3], 64  }
  0xea   :  { %354 = vsyncadd [#allocation3], 4294967232 }
  0xeb   :  { %295 = vsyncpa [#allocation3], 1 }

</bundles_post_ra>
